<compile_context>
chip_gen: v7x
topology: tpu7x:2x2x1
jax: 0.10.0
libtpu: 0.0.40
codegen_flags: <defaults>
</compile_context>

<pallas_src>
import functools

import jax
import jax.numpy as jnp
from jax.experimental import pallas as pl
from jax.experimental.pallas import tpu as pltpu

LANES = 128
SUBLANES = 8
MAX_TILE_ROWS = 1024  # (1024, 128) f32 block = 512 KiB per pipeline buffer


def _round_up(a, b):
    return (a + b - 1) // b * b


def _choose_tiling(n):
    """Return (rows_total, tile_rows) for a flattened size-n array."""
    rows = max(1, (n + LANES - 1) // LANES)
    rows8 = _round_up(rows, SUBLANES)
    if rows8 <= MAX_TILE_ROWS:
        return rows8, rows8  # a single block covers everything
    tile = MAX_TILE_ROWS
    return _round_up(rows8, tile), tile


def _gumbel_train_kernel(x_ref, u_ref, o_ref, *, eps):
    x = x_ref[...].astype(jnp.float32)
    u = u_ref[...]
    # Logistic noise == g1 - g2 of two iid Gumbel(0,1) samples.
    noise = jnp.log(u + eps) - jnp.log(1.0 - u + eps)
    # Forward value of the straight-through estimator:
    #   (sigmoid((x + noise) / T) >= 0.5)  ==  (x + noise >= 0)   for T > 0.
    o_ref[...] = ((x + noise) >= 0.0).astype(o_ref.dtype)


def _threshold_kernel(x_ref, o_ref):
    # Eval path: (x >= 0).float().  Also the forward value of the noise-free
    # training path, since sigmoid(x / T) >= 0.5  <=>  x >= 0.
    o_ref[...] = (x_ref[...].astype(jnp.float32) >= 0.0).astype(o_ref.dtype)


def _as_slab(x, rows_total):
    """View/pad x as a lane-dense (rows_total, 128) slab.

    Fast path (reshape only, no pad copy) when the element count already
    fills the slab exactly.
    """
    n = x.size
    padded = rows_total * LANES
    flat = x.reshape(-1)
    if padded == n:
        return flat.reshape(rows_total, LANES), False
    flat = jnp.pad(flat, (0, padded - n))
    return flat.reshape(rows_total, LANES), True


def gumbel_forward(x, *, temperature=1.0, gumbel_noise=True, training=True,
                   eps=1e-8, key=None):
    """Pallas implementation of Gumbel.forward (forward value).

    Returns a float32 array of x's shape containing {0., 1.}.
    `temperature` does not affect the hard forward value (for any T > 0).
    """
    del temperature
    orig_shape = x.shape
    n = x.size
    rows_total, tile_rows = _choose_tiling(n)
    grid = (rows_total // tile_rows,)
    x2d, was_padded = _as_slab(x, rows_total)

    block = pl.BlockSpec((tile_rows, LANES), lambda i: (i, 0))
    out_shape = jax.ShapeDtypeStruct((rows_total, LANES), jnp.float32)
    cparams = pltpu.CompilerParams(dimension_semantics=("parallel",))

    if training and gumbel_noise:
        if key is None:
            key = jax.random.PRNGKey(0)
        u = jax.random.uniform(key, (rows_total, LANES), dtype=jnp.float32)
        out2d = pl.pallas_call(
            functools.partial(_gumbel_train_kernel, eps=float(eps)),
            out_shape=out_shape,
            grid=grid,
            in_specs=[block, block],
            out_specs=block,
            compiler_params=cparams,
        )(x2d, u)
    else:
        # Eval mode, and the forward value of training without gumbel noise.
        out2d = pl.pallas_call(
            _threshold_kernel,
            out_shape=out_shape,
            grid=grid,
            in_specs=[block],
            out_specs=block,
            compiler_params=cparams,
        )(x2d)

    out = out2d
    if was_padded:
        out = out.reshape(-1)[:n]
    return out.reshape(orig_shape)


if __name__ == "__main__":
    key = jax.random.PRNGKey(0)
    kx, knoise = jax.random.split(key)
    # Shape consistent with the module's typical use on conv activations.
    x = jax.random.normal(kx, (2, 4, 16, 16), dtype=jnp.float32)

    # Training-mode forward (Gumbel noise + straight-through hard value).
    y_train = gumbel_forward(x, temperature=1.0, gumbel_noise=True,
                             training=True, key=knoise)
    y_train = jax.block_until_ready(y_train)

    # Eval-mode forward: (x >= 0).float()
    y_eval = gumbel_forward(x, training=False)
    y_eval = jax.block_until_ready(y_eval)

    # Sanity checks.
    assert y_train.shape == x.shape and y_eval.shape == x.shape
    assert y_train.dtype == jnp.float32 and y_eval.dtype == jnp.float32
    assert bool(jnp.all((y_train == 0.0) | (y_train == 1.0)))
    assert bool(jnp.all(y_eval == (x >= 0).astype(jnp.float32)))
    assert not bool(jnp.any(jnp.isnan(y_train)))

    print("KERNEL_OK")
</pallas_src>

<mosaic_0001>
module attributes {stable_mosaic.version = 11 : i64} {
  func.func @_gumbel_train_kernel(%arg0: i32, %arg1: memref<16x128xf32, #tpu.memory_space<vmem>>, %arg2: memref<16x128xf32, #tpu.memory_space<vmem>>, %arg3: memref<16x128xf32, #tpu.memory_space<vmem>>) attributes {dimension_semantics = [#tpu.dimension_semantics<parallel>], iteration_bounds = array<i64: 1>, scalar_prefetch = 0 : i64, scratch_operands = 0 : i64, tpu.core_type = #tpu.core_type<tc>, window_params = [{transform_indices = @transform_0, window_bounds = array<i64: 16, 128>}, {transform_indices = @transform_1, window_bounds = array<i64: 16, 128>}, {transform_indices = @transform_2, window_bounds = array<i64: 16, 128>}]} {
    %c0 = arith.constant 0 : index
    %c0_0 = arith.constant 0 : index
    %0 = vector.load %arg1[%c0, %c0_0] : memref<16x128xf32, #tpu.memory_space<vmem>>, vector<16x128xf32>
    %c0_1 = arith.constant 0 : index
    %c0_2 = arith.constant 0 : index
    %1 = vector.load %arg2[%c0_1, %c0_2] : memref<16x128xf32, #tpu.memory_space<vmem>>, vector<16x128xf32>
    %cst = arith.constant 9.99999993E-9 : f32
    %2 = vector.broadcast %cst : f32 to vector<16x128xf32>
    %3 = arith.addf %1, %2 : vector<16x128xf32>
    %4 = math.log %3 : vector<16x128xf32>
    %cst_3 = arith.constant 1.000000e+00 : f32
    %5 = vector.broadcast %cst_3 : f32 to vector<16x128xf32>
    %6 = arith.subf %5, %1 : vector<16x128xf32>
    %cst_4 = arith.constant 9.99999993E-9 : f32
    %7 = vector.broadcast %cst_4 : f32 to vector<16x128xf32>
    %8 = arith.addf %6, %7 : vector<16x128xf32>
    %9 = math.log %8 : vector<16x128xf32>
    %10 = arith.subf %4, %9 : vector<16x128xf32>
    %11 = arith.addf %0, %10 : vector<16x128xf32>
    %cst_5 = arith.constant 0.000000e+00 : f32
    %12 = vector.broadcast %cst_5 : f32 to vector<16x128xf32>
    %13 = arith.cmpf oge, %11, %12 : vector<16x128xf32>
    %14 = arith.extui %13 : vector<16x128xi1> to vector<16x128xi32>
    %15 = arith.sitofp %14 : vector<16x128xi32> to vector<16x128xf32>
    %c0_6 = arith.constant 0 : index
    %c0_7 = arith.constant 0 : index
    %16 = vector.load %arg3[%c0_6, %c0_7] : memref<16x128xf32, #tpu.memory_space<vmem>>, vector<16x128xf32>
    tpu.vector_store %arg3[%c0_6, %c0_7], %15 {strides = array<i32>} : memref<16x128xf32, #tpu.memory_space<vmem>>, vector<16x128xf32>,
    return
  }
  func.func @transform_0(%arg0: i32) -> (i32, i32) {
    %c0_i32 = arith.constant 0 : i32
    %c0_i32_0 = arith.constant 0 : i32
    return %arg0, %c0_i32 : i32, i32
  }
  func.func @transform_1(%arg0: i32) -> (i32, i32) {
    %c0_i32 = arith.constant 0 : i32
    %c0_i32_0 = arith.constant 0 : i32
    return %arg0, %c0_i32 : i32, i32
  }
  func.func @transform_2(%arg0: i32) -> (i32, i32) {
    %c0_i32 = arith.constant 0 : i32
    %c0_i32_0 = arith.constant 0 : i32
    return %arg0, %c0_i32 : i32, i32
  }
}

</mosaic_0001>

<bundles_post_ra>
// kernel: tpu_custom_call.1
= control target key start
LH: loop header
LB: loop body
LE: loop exit
PB: predicated region body
PF: predicated region fallthrough
CT: control target
= control target key end

     0   :  { %7 = vsyncpa [#allocation3], 0  ;;  %s242_s0 = inlined_call_operand.hbm [shape: f32[16,128], index: 0, kind: input, shape index: {}]   ;;  %s243_s1 = inlined_call_operand.hbm [shape: f32[16,128], index: 1, kind: input, shape index: {}]   ;;  %s244_s2 = inlined_call_operand.hbm [shape: f32[16,128], index: 2, kind: output, shape index: {}]  }
   0x1   :  { %8 = vsyncpa [#allocation6], 0 }
   0x2   :  { %9 = vsyncpa [#allocation4], 0  ;;  %s176_s9 = smov [#allocation2]   ;;  %s104_s13 = scalar_lea.hbm %s242_s0, 256 }
   0x3   :  { %s15_s10 = sshll.u32 %s176_s9, 4  ;;  %p105_p0 = scmp.ne.s32.totalorder %s242_s0, %s104_s13  ;;  %s16_s10 = int_to_ptr.vmem [resolvable:$true] %s15_s10 }
   0x4   :  { %p108_p1 = scmp.lt.u32.totalorder %s104_s13, %s242_s0 }
   0x6   :  { %p110_p2 = pnand %p108_p1, %p105_p0 }
   0x8   :  { %113 = shalt.err (!%p110_p2)
}
   0x9   :  { %s114_s18 = scalar_lea.vmem %s16_s10, 256  ;;  %p119_p4 = scmp.lt.s32.totalorder %s16_s10, %s16_s10 }
   0xa   :  { %p115_p3 = scmp.ne.s32.totalorder %s16_s10, %s114_s18  ;;  %p120_p5 = scmp.lt.s32.totalorder %s114_s18, %s114_s18 }
   0xc   :  { %p121_p6 = por %p120_p5, %p119_p4 }
   0xe   :  { %p122_p7 = pnand %p121_p6, %p115_p3 }
  0x10   :  { %125 = shalt.err (!%p122_p7)
}
  0x11   :  { %s177_s19 = smov 128   ;;  %s178_s20 = smov 8  }
  0x12   :  { %21 = dma.hbm_to_vmem [thread:$0]  %s242_s0, 256, %s16_s10, [#allocation3], %s177_s19, %s177_s19, %s178_s20  }
  0x13   :  { %s179_s23 = smov [#allocation5]   ;;  %s126_s27 = scalar_lea.hbm %s243_s1, 256 }
  0x14   :  { %s27_s24 = sshll.u32 %s179_s23, 4  ;;  %p127_p8 = scmp.ne.s32.totalorder %s243_s1, %s126_s27  ;;  %s28_s24 = int_to_ptr.vmem [resolvable:$true] %s27_s24 }
  0x15   :  { %p130_p9 = scmp.lt.u32.totalorder %s126_s27, %s243_s1 }
  0x17   :  { %p132_p10 = pnand %p130_p9, %p127_p8 }
  0x19   :  { %135 = shalt.err (!%p132_p10)
}
  0x1a   :  { %s136_s4 = scalar_lea.vmem %s28_s24, 256  ;;  %p141_p12 = scmp.lt.s32.totalorder %s28_s24, %s28_s24 }
  0x1b   :  { %p137_p11 = scmp.ne.s32.totalorder %s28_s24, %s136_s4  ;;  %p142_p13 = scmp.lt.s32.totalorder %s136_s4, %s136_s4 }
  0x1d   :  { %p143_p0 = por %p142_p13, %p141_p12 }
  0x1f   :  { %p144_p1 = pnand %p143_p0, %p137_p11 }
  0x21   :  { %147 = shalt.err (!%p144_p1)
}
  0x22   :  { %33 = dma.hbm_to_vmem [thread:$0]  %s243_s1, 256, %s28_s24, [#allocation6], %s177_s19, %s177_s19, %s178_s20  }
  0x23   :  { %170 = dma.done.wait [#allocation3], 256  }
  0x24   :  { %171 = vsyncadd [#allocation3], 4294967040 }
  0x25   :  { %172 = dma.done.wait [#allocation6], 256  }
  0x26   :  { %173 = vsyncadd [#allocation6], 4294967040  ;;  %v42_v0 = vld [vmem:[#allocation5] sm:$0xff]  ;;  %v43_v3 = vld [vmem:[#allocation5 + $0x8] sm:$0xff]  ;;  %s180_s1 = smov [#allocation7]   ;;  %v181_v22 = vmov 0.0  }
  0x27   :  { %v44_v1 = vadd.f32 1e-08, %v42_v0  ;;  %v50_v2 = vsub.f32 1.0, %v42_v0  ;;  %v45_v4 = vadd.f32 1e-08, %v43_v3  ;;  %v51_v5 = vsub.f32 1.0, %v43_v3 }
  0x28   :  { %v40_v15 = vld [vmem:[#allocation2] sm:$0xff]  ;;  %v41_v18 = vld [vmem:[#allocation2 + $0x8] sm:$0xff]  ;;  %s75_s6 = sshll.u32 %s180_s1, 4  ;;  %s76_s6 = int_to_ptr.vmem [resolvable:$true] %s75_s6 }
  0x29   :  { %96 = vlog2.f32 %v44_v1  ;;  %v52_v6 = vadd.f32 1e-08, %v50_v2  ;;  %v53_v7 = vadd.f32 1e-08, %v51_v5  ;;  %s148_s7 = scalar_lea.vmem %s76_s6, 256  ;;  %p153_p3 = scmp.lt.s32.totalorder %s76_s6, %s76_s6 }
  0x2a   :  { %98 = vlog2.f32 %v45_v4  ;;  %p149_p2 = scmp.ne.s32.totalorder %s76_s6, %s148_s7  ;;  %p154_p4 = scmp.lt.s32.totalorder %s148_s7, %s148_s7 }
  0x2b   :  { %100 = vlog2.f32 %v52_v6 }
  0x2c   :  { %102 = vlog2.f32 %v53_v7  ;;  %p155_p5 = por %p154_p4, %p153_p3 }
  0x2e   :  { %p156_p6 = pnand %p155_p5, %p149_p2 }
  0x33   :  { %v97_v8 = vpop.eup %96 }
  0x34   :  { %v99_v9 = vpop.eup %98  ;;  %v47_v10 = vmul.f32 0.6931472, %v97_v8 }
  0x35   :  { %v101_v11 = vpop.eup %100  ;;  %v49_v12 = vmul.f32 0.6931472, %v99_v9 }
  0x36   :  { %v103_v13 = vpop.eup %102  ;;  %v55_v14 = vmul.f32 0.6931472, %v101_v11 }
  0x37   :  { %v57_v16 = vmul.f32 0.6931472, %v103_v13 }
  0x38   :  { %v58_v17 = vsub.f32 %v47_v10, %v55_v14 }
  0x39   :  { %v59_v19 = vsub.f32 %v49_v12, %v57_v16 }
  0x3a   :  { %v60_v20 = vadd.f32 %v58_v17, %v40_v15 }
  0x3b   :  { %v61_v21 = vadd.f32 %v59_v19, %v41_v18 }
  0x3c   :  { %vm62_vm0 = vcmp.ge.f32.partialorder %v60_v20, 0.0 }
  0x3d   :  { %v88_v23 = vsel %vm62_vm0, 1.0, %v181_v22  ;;  %vm63_vm1 = vcmp.ge.f32.partialorder %v61_v21, 0.0 }
  0x3e   :  { %68 = vst [vmem:[#allocation7] sm:$0xff] %v88_v23  ;;  %v89_v24 = vsel %vm63_vm1, 1.0, %v181_v22 }
  0x3f   :  { %69 = vst [vmem:[#allocation7 + $0x8] sm:$0xff] %v89_v24 }
  0x40   :  { %159 = shalt.err (!%p156_p6)
}
  0x41   :  { %s160_s10 = scalar_lea.hbm %s244_s2, 256 }
  0x42   :  { %p161_p7 = scmp.ne.s32.totalorder %s244_s2, %s160_s10  ;;  %p164_p8 = scmp.lt.u32.totalorder %s160_s10, %s244_s2 }
  0x44   :  { %p166_p9 = pnand %p164_p8, %p161_p7 }
  0x46   :  { %169 = shalt.err (!%p166_p9)
}
  0x47   :  { %81 = dma.vmem_to_hbm [thread:$0]  %s76_s6, 256, %s244_s2, [#allocation4], %s177_s19, %s177_s19, %s178_s20  }
  0x48   :  { %174 = dma.done.wait [#allocation4], 256  }
  0x49   :  { %175 = vsyncadd [#allocation4], 4294967040 }
  0x4a   :  { %85 = vsyncpa [#allocation3], 1 }
  0x4b   :  { %86 = vsyncpa [#allocation6], 1 }
  0x4c   :  { %87 = vsyncpa [#allocation4], 1 }

</bundles_post_ra>
